<compile_context>
chip_gen: v7x
topology: tpu7x:2x2x1
jax: 0.10.0
libtpu: 0.0.40
codegen_flags: <defaults>
</compile_context>

<pallas_src>
import functools

import jax
import jax.numpy as jnp
from jax.experimental import pallas as pl
from jax.experimental.pallas import tpu as pltpu


def critic_kernel(x_ref, w1_ref, b1_ref, w2r_ref, b2_ref, o_ref):
    # fc1 + ReLU: (tm, S) @ (S, H) + (1, H) -> (tm, H)
    h = jnp.dot(x_ref[...], w1_ref[...], preferred_element_type=jnp.float32) + b1_ref[...]
    h = jnp.maximum(h, 0.0)
    # fc2 value head, computed transposed so the batch tile maps to lanes:
    # (1, H) @ (H, tm) -> (1, tm), lane-dense output row.
    o_ref[...] = (
        jnp.dot(w2r_ref[...], h.T, preferred_element_type=jnp.float32) + b2_ref[...]
    )


@functools.partial(jax.jit, static_argnames=("tm",))
def critic_forward(state, w1, b1, w2, b2, *, tm=128):
    batch, state_dim = state.shape
    hidden = w1.shape[1]

    # fc2 weight as a (1, hidden) row; bias as a (1, 1) scalar tile.
    w2_row = w2.reshape(hidden, 1).T
    b2_sc = b2.reshape(1, 1)

    # Pad batch up to a multiple of tm so the grid tiles exactly.
    padded_batch = pl.cdiv(batch, tm) * tm
    x = jnp.pad(state, ((0, padded_batch - batch), (0, 0)))

    flops = 2 * padded_batch * hidden * (state_dim + 1)
    bytes_accessed = 4 * (
        padded_batch * state_dim          # state in
        + state_dim * hidden + hidden     # w1, b1
        + hidden + 1                      # w2 row, b2
        + padded_batch                    # output (one value per row)
    )

    out = pl.pallas_call(
        critic_kernel,
        out_shape=jax.ShapeDtypeStruct((1, padded_batch), jnp.float32),
        grid=(padded_batch // tm,),
        in_specs=[
            # batch-tiled activations (pipelined across grid steps)
            pl.BlockSpec((tm, state_dim), lambda i: (i, 0)),
            # weights / biases: constant index maps -> VMEM-resident
            pl.BlockSpec((state_dim, hidden), lambda i: (0, 0)),
            pl.BlockSpec((1, hidden), lambda i: (0, 0)),
            pl.BlockSpec((1, hidden), lambda i: (0, 0)),
            pl.BlockSpec((1, 1), lambda i: (0, 0)),
        ],
        # Each grid step writes a lane-dense (1, tm) slice of the value row.
        out_specs=pl.BlockSpec((1, tm), lambda i: (0, i)),
        compiler_params=pltpu.CompilerParams(
            dimension_semantics=("parallel",)),
        cost_estimate=pl.CostEstimate(
            flops=flops, transcendentals=0, bytes_accessed=bytes_accessed),
    )(x, w1, b1, w2_row, b2_sc)

    # Un-pad batch and restore the (batch, 1) value-head shape.
    return out[0, :batch][:, None]


def init_linear(key, fan_in, fan_out):
    # PyTorch nn.Linear default init: U(-1/sqrt(fan_in), 1/sqrt(fan_in))
    kw, kb = jax.random.split(key)
    bound = 1.0 / jnp.sqrt(jnp.float32(fan_in))
    w = jax.random.uniform(kw, (fan_in, fan_out), jnp.float32, -bound, bound)
    b = jax.random.uniform(kb, (1, fan_out), jnp.float32, -bound, bound)
    return w, b


if __name__ == "__main__":
    # Deterministic setup: state_dim=16, hidden_dim=128, batch=512 (so the
    # 1-D grid has several steps and the pipeline is exercised).
    batch, state_dim, hidden_dim = 512, 16, 128

    key = jax.random.PRNGKey(0)
    k_state, k1, k2 = jax.random.split(key, 3)

    state = jax.random.normal(k_state, (batch, state_dim), jnp.float32)
    w1, b1 = init_linear(k1, state_dim, hidden_dim)
    w2, b2 = init_linear(k2, hidden_dim, 1)

    value = critic_forward(state, w1, b1, w2, b2, tm=128)
    value = jax.block_until_ready(value)

    # Pure-JAX reference of CriticPPO2.forward: fc2(relu(fc1(x)))
    h = jnp.maximum(state @ w1 + b1, 0.0)
    ref = h @ w2 + b2

    assert value.shape == (batch, 1), value.shape
    assert jnp.allclose(value, ref, atol=1e-5, rtol=1e-5)

    print("KERNEL_OK")
</pallas_src>

<mosaic_0001>
module attributes {stable_mosaic.version = 11 : i64} {
  func.func @critic_kernel(%arg0: i32, %arg1: memref<128x16xf32, #tpu.memory_space<vmem>>, %arg2: memref<16x128xf32, #tpu.memory_space<vmem>>, %arg3: memref<1x128xf32, #tpu.memory_space<vmem>>, %arg4: memref<1x128xf32, #tpu.memory_space<vmem>>, %arg5: memref<1x1xf32, #tpu.memory_space<vmem>>, %arg6: memref<1x128xf32, #tpu.memory_space<vmem>>) attributes {dimension_semantics = [#tpu.dimension_semantics<parallel>], iteration_bounds = array<i64: 4>, scalar_prefetch = 0 : i64, scratch_operands = 0 : i64, tpu.core_type = #tpu.core_type<tc>, window_params = [{transform_indices = @transform_0, window_bounds = array<i64: 128, 16>}, {pipeline_mode = #tpu.pipeline_mode<synchronous>, transform_indices = @transform_1, window_bounds = array<i64: 16, 128>}, {pipeline_mode = #tpu.pipeline_mode<synchronous>, transform_indices = @transform_2, window_bounds = array<i64: 1, 128>}, {pipeline_mode = #tpu.pipeline_mode<synchronous>, transform_indices = @transform_3, window_bounds = array<i64: 1, 128>}, {pipeline_mode = #tpu.pipeline_mode<synchronous>, transform_indices = @transform_4, window_bounds = array<i64: 1, 1>}, {transform_indices = @transform_5, window_bounds = array<i64: 1, 128>}]} {
    %c0 = arith.constant 0 : index
    %c0_0 = arith.constant 0 : index
    %0 = vector.load %arg1[%c0, %c0_0] : memref<128x16xf32, #tpu.memory_space<vmem>>, vector<128x16xf32>
    %c0_1 = arith.constant 0 : index
    %c0_2 = arith.constant 0 : index
    %1 = vector.load %arg2[%c0_1, %c0_2] : memref<16x128xf32, #tpu.memory_space<vmem>>, vector<16x128xf32>
    %cst = arith.constant dense<0.000000e+00> : vector<128x128xf32>
    %2 = tpu.matmul %0, %1, %cst {dimension_numbers = #tpu.dot_dimension_numbers<[1], [0], [0], [1], [0, 0, 1, 1], [], []>} : vector<128x16xf32>, vector<16x128xf32>, vector<128x128xf32> -> vector<128x128xf32>
    %c0_3 = arith.constant 0 : index
    %c0_4 = arith.constant 0 : index
    %3 = vector.load %arg3[%c0_3, %c0_4] : memref<1x128xf32, #tpu.memory_space<vmem>>, vector<1x128xf32>
    %4 = vector.broadcast %3 : vector<1x128xf32> to vector<128x128xf32>
    %5 = arith.addf %2, %4 : vector<128x128xf32>
    %cst_5 = arith.constant 0.000000e+00 : f32
    %6 = vector.broadcast %cst_5 : f32 to vector<128x128xf32>
    %7 = arith.maximumf %5, %6 : vector<128x128xf32>
    %c0_6 = arith.constant 0 : index
    %c0_7 = arith.constant 0 : index
    %8 = vector.load %arg4[%c0_6, %c0_7] : memref<1x128xf32, #tpu.memory_space<vmem>>, vector<1x128xf32>
    %9 = tpu.transpose %7, [1, 0] : vector<128x128xf32> -> vector<128x128xf32>
    %cst_8 = arith.constant dense<0.000000e+00> : vector<1x128xf32>
    %10 = tpu.matmul %8, %9, %cst_8 {dimension_numbers = #tpu.dot_dimension_numbers<[1], [0], [0], [1], [0, 0, 1, 1], [], []>} : vector<1x128xf32>, vector<128x128xf32>, vector<1x128xf32> -> vector<1x128xf32>
    %c0_9 = arith.constant 0 : index
    %c0_10 = arith.constant 0 : index
    %11 = vector.load %arg5[%c0_9, %c0_10] : memref<1x1xf32, #tpu.memory_space<vmem>>, vector<1x1xf32>
    %12 = vector.broadcast %11 : vector<1x1xf32> to vector<1x128xf32>
    %13 = arith.addf %10, %12 : vector<1x128xf32>
    %c0_11 = arith.constant 0 : index
    %c0_12 = arith.constant 0 : index
    %14 = vector.load %arg6[%c0_11, %c0_12] : memref<1x128xf32, #tpu.memory_space<vmem>>, vector<1x128xf32>
    tpu.vector_store %arg6[%c0_11, %c0_12], %13 {strides = array<i32>} : memref<1x128xf32, #tpu.memory_space<vmem>>, vector<1x128xf32>,
    return
  }
  func.func @transform_0(%arg0: i32) -> (i32, i32) {
    %c0_i32 = arith.constant 0 : i32
    %c0_i32_0 = arith.constant 0 : i32
    return %arg0, %c0_i32 : i32, i32
  }
  func.func @transform_1(%arg0: i32) -> (i32, i32) {
    %c0_i32 = arith.constant 0 : i32
    %c0_i32_0 = arith.constant 0 : i32
    %c0_i32_1 = arith.constant 0 : i32
    return %c0_i32, %c0_i32_0 : i32, i32
  }
  func.func @transform_2(%arg0: i32) -> (i32, i32) {
    %c0_i32 = arith.constant 0 : i32
    %c0_i32_0 = arith.constant 0 : i32
    %c0_i32_1 = arith.constant 0 : i32
    return %c0_i32, %c0_i32_0 : i32, i32
  }
  func.func @transform_3(%arg0: i32) -> (i32, i32) {
    %c0_i32 = arith.constant 0 : i32
    %c0_i32_0 = arith.constant 0 : i32
    %c0_i32_1 = arith.constant 0 : i32
    return %c0_i32, %c0_i32_0 : i32, i32
  }
  func.func @transform_4(%arg0: i32) -> (i32, i32) {
    %c0_i32 = arith.constant 0 : i32
    %c0_i32_0 = arith.constant 0 : i32
    %c0_i32_1 = arith.constant 0 : i32
    return %c0_i32, %c0_i32_0 : i32, i32
  }
  func.func @transform_5(%arg0: i32) -> (i32, i32) {
    %c0_i32 = arith.constant 0 : i32
    %c0_i32_0 = arith.constant 0 : i32
    return %c0_i32, %arg0 : i32, i32
  }
}

</mosaic_0001>

<bundles_post_ra>
// kernel: critic_forward.1
= control target key start
LH: loop header
LB: loop body
LE: loop exit
PB: predicated region body
PF: predicated region fallthrough
CT: control target
= control target key end

     0   :  { %s1062_s0 = inlined_call_operand.vmem [shape: f32[512,16], index: 0, kind: input, shape index: {}]   ;;  %s1063_s1 = inlined_call_operand.vmem [shape: f32[16,128], index: 1, kind: input, shape index: {}]   ;;  %s1064_s2 = inlined_call_operand.vmem [shape: f32[1,128], index: 2, kind: input, shape index: {}]   ;;  %s1065_s3 = inlined_call_operand.vmem [shape: f32[1,128], index: 3, kind: input, shape index: {}]   ;;  %s1066_s4 = inlined_call_operand.<no memory space> [shape: f32[1,1], index: 4, kind: input, shape index: {}]   ;;  %s1067_s5 = inlined_call_operand.hbm [shape: f32[1,512], index: 5, kind: output, shape index: {}]  }
   0x1   :  { %v10_v0 = vstv %s1066_s4 }
   0x2   :  { %11 = vst [vmem:[#allocation2] sm:$0x1] %v10_v0 }
   0x3   :  { %12 = vsyncpa [#allocation4], 0 }
   0x4   :  { %14 = vsyncpa [#allocation4 + $0x1], 0  ;;  %s909_s20 = smov 0   ;;  %s911_s21 = smov 0  }
   0x5   :  { %s913_s22 = smov 0   ;;  %s915_s23 = smov 0  }
   0x6 LB: > { %s610_s4 = sadd.s32 4294967295, %s869_s23   ;;  %s611_s24 = sadd.s32 4294967294, %s869_s23   ;;  %s869_s23 = sphi %s915_s23, %s1073_s23   ;;  %s865_s22 = sphi %s913_s22, %s1072_s22   ;;  %s861_s21 = sphi %s911_s21, %s1071_s21   ;;  %s857_s20 = sphi %s909_s20, %s1070_s20  }
   0x7   : > { %s932_s25 = sadd.s32 1, %s869_s23   ;;  %s137_s26 = sadd.s32 1, %s865_s22 }
   0x8   : > { %s134_s27 = ssub.s32 %s869_s23, %s932_s25  ;;  %p147_p0 = scmp.ne.s32.totalorder %s865_s22, %s861_s21 }
   0x9   : > { %p135_p1 = scmp.eq.s32.totalorder %s134_s27, 0  ;;  %p148_p2 = scmp.eq.s32.totalorder %s610_s4, 3 }
   0xa   : > { %p153_p3 = scmp.ne.s32.totalorder %s861_s21, %s857_s20  ;;  %p154_p4 = scmp.eq.s32.totalorder %s611_s24, 3 }
   0xb   : > { %s942_s28 = scalar_select %p135_p1, %s865_s22, %s137_s26  }
   0xc   : > { %p944_p5 = por %p148_p2, %p147_p0  ;;  %p948_p6 = por %p154_p4, %p153_p3 }
   0xd   : > { %p614_p7 = scmp.ge.s32.totalorder %s869_s23, 1  ;;  %p193_p8 = scmp.lt.s32.totalorder %s869_s23, 5 }
   0xf   : > { %p194_p9 = pnand %p614_p7, %p193_p8 }
  0x10   : > { %v242_v1 = vld [vmem:[%s1063_s1] sm:$0xff] (!%p194_p9)  ;;  %v243_v2 = vld [vmem:[%s1063_s1 + $0x8] sm:$0xff] (!%p194_p9)  ;;  %s960_s10 = sshll.u32 (!%p194_p9), %s610_s4, 4  ;;  %vm251_vm0 = vcmask (!%p194_p9), 130048   ;;  %v871_v20 = vmov (!%p194_p9), 0.0|0.0   ;;  %vm872_vm1 = vmmov (!%p194_p9), 0  }
  0x11   : > { %197 = sbr.rel (%p194_p9) target bundleno = 540 (0x21c), region = 40  ;;  %v735_v3 = vpack.c.bf16 (!%p194_p9), %v243_v2, %v242_v1  ;;  %p221_p10 = scmp.lt.s32.totalorder (!%p194_p9), %s960_s10, 63  ;;  %739 = vmatprep.subr.bf16.mxu1 (!%p194_p9), %v871_v20  ;;  %v873_v21 = vmov (!%p194_p9), 0.0   ;;  %v462_v22 = vld [vmem:[#allocation2] sm:$0x1] (!%p194_p9)  ;;  %v874_v23 = vmov (!%p194_p9), 0  }
  0x12   : > { %732 = vmatprep.mubr.msk.f32.mxu1 (!%p194_p9), %vm872_vm1, %v873_v21  ;;  %806 = vset.pattern.permute.xlu0 (!%p194_p9), %v874_v23  ;;  %v617_v24 = vld [vmem:[%s1064_s2] ss:$0 sm:$0xff] (!%p194_p9)  ;;  %s218_s4 = sand.u32 (!%p194_p9), 1, %s861_s21   ;;  %s1020_s7 = scalar_lea.hbm (!%p194_p9), %s1067_s5, %s960_s10 }
  0x13   : > { %736 = vmatprep.subr.bf16.mxu0 (!%p194_p9), %v735_v3  ;;  %465 = vperm.xlu0 (!%p194_p9), %806, %v462_v22   ;;  %s219_s24 = scalar_lea.vmem (!%p194_p9), [#allocation3], %s218_s4  ;;  %s544_s8 = scalar_lea.sflag (!%p194_p9), [#allocation4], %s218_s4 }
  0x14   : > { %738 = vmatpush3.bf16.msra.mxu0 (!%p194_p9), %v735_v3  ;;  %s556_s26 = sshll.u32 (!%p194_p9), %s219_s24, 4  ;;  %s1022_s26 = int_to_ptr.vmem [resolvable:$true] %s556_s26 }
  0x15   : > { %s807_s9 = scalar_lea.vmem (!%p194_p9), %s1022_s26, 16 }
  0x16   : > { %p808_p11 = scmp.ne.s32.totalorder (!%p194_p9), %s1022_s26, %s807_s9 }
  0x18   : > { %s222_s11 = scalar_select %p221_p10, %s960_s10, 63 }
  0x19   : > { %p809_p12 = pnand %p808_p11, %p944_p5 }
  0x1a   : > { %s616_s12 = sshll.u32 %s222_s11, 3  ;;  %s875_s11 = smov [#allocation3]  }
  0x1b   : > { %s967_s15 = scalar_lea.vmem %s1062_s0, %s616_s12  ;;  %p810_p13 = pneg %p809_p12 }
  0x1c   : > { %v226_v4 = vld [vmem:[%s967_s15] sm:$0xff]  ;;  %v227_v5 = vld [vmem:[%s967_s15 + $0x8] sm:$0xff]  ;;  %v228_v6 = vld [vmem:[%s967_s15 + $0x10] sm:$0xff]  ;;  %s811_s12 = sshll.u32 %s875_s11, 4  ;;  %s812_s12 = int_to_ptr.vmem [resolvable:$false] %s811_s12 }
  0x1d   : > { %676 = vmatprep.mubr.msk.f32.mxu0 %vm251_vm0, %v226_v4  ;;  %v229_v7 = vld [vmem:[%s967_s15 + $0x18] sm:$0xff]  ;;  %v230_v8 = vld [vmem:[%s967_s15 + $0x20] sm:$0xff]  ;;  %v231_v9 = vld [vmem:[%s967_s15 + $0x28] sm:$0xff]  ;;  %s813_s13 = scalar_lea.vmem %s812_s12, 32  ;;  %p814_p0 = scmp.lt.s32.totalorder %s1022_s26, %s812_s12 }
  0x1e   : > { %677 = vmatmul.mubr.msk.f32.vlgmr.msra.gmra.mrb[0].mxu0 %vm251_vm0, %v227_v5  ;;  %v232_v10 = vld [vmem:[%s967_s15 + $0x30] sm:$0xff]  ;;  %v233_v11 = vld [vmem:[%s967_s15 + $0x38] sm:$0xff]  ;;  %v234_v12 = vld [vmem:[%s967_s15 + $0x40] sm:$0xff]  ;;  %p815_p1 = scmp.lt.s32.totalorder %s813_s13, %s807_s9 }
  0x1f   : > { %679 = vmatprep.mubr.msk.f32.mxu0 %vm251_vm0, %v228_v6  ;;  %v235_v13 = vld [vmem:[%s967_s15 + $0x48] sm:$0xff]  ;;  %v236_v14 = vld [vmem:[%s967_s15 + $0x50] sm:$0xff]  ;;  %v237_v15 = vld [vmem:[%s967_s15 + $0x58] sm:$0xff] }
  0x20   : > { %v238_v16 = vld [vmem:[%s967_s15 + $0x60] sm:$0xff]  ;;  %v239_v17 = vld [vmem:[%s967_s15 + $0x68] sm:$0xff]  ;;  %v240_v18 = vld [vmem:[%s967_s15 + $0x70] sm:$0xff]  ;;  %p816_p2 = por %p815_p1, %p814_p0 }
  0x21   : > { %v241_v19 = vld [vmem:[%s967_s15 + $0x78] sm:$0xff] }
  0x22   : > { %680 = vmatmul.mubr.msk.f32.gmra.mrb[2].mxu0 %vm251_vm0, %v229_v7  ;;  %p817_p3 = pnand %p816_p2, %p810_p13 }
  0x23   : > { %682 = vmatprep.mubr.msk.f32.mxu0 %vm251_vm0, %v230_v8 }
  0x26   : > { %683 = vmatmul.mubr.msk.f32.gmra.mrb[4].mxu0 %vm251_vm0, %v231_v9 }
  0x27   : > { %685 = vmatprep.mubr.msk.f32.mxu0 %vm251_vm0, %v232_v10 }
  0x2a   : > { %686 = vmatmul.mubr.msk.f32.gmra.mrb[6].mxu0 %vm251_vm0, %v233_v11 }
  0x2b   : > { %688 = vmatprep.mubr.msk.f32.mxu0 %vm251_vm0, %v234_v12 }
  0x2e   : > { %689 = vmatmul.mubr.msk.f32.gmra.mrb[8].mxu0 %vm251_vm0, %v235_v13 }
  0x2f   : > { %691 = vmatprep.mubr.msk.f32.mxu0 %vm251_vm0, %v236_v14 }
  0x32   : > { %692 = vmatmul.mubr.msk.f32.gmra.mrb[10].mxu0 %vm251_vm0, %v237_v15 }
  0x33   : > { %694 = vmatprep.mubr.msk.f32.mxu0 %vm251_vm0, %v238_v16 }
  0x36   : > { %695 = vmatmul.mubr.msk.f32.gmra.mrb[12].mxu0 %vm251_vm0, %v239_v17  ;;  %v461_v17 = vld [vmem:[%s1065_s3] sm:$0x1] }
  0x37   : > { %697 = vmatprep.mubr.msk.f32.mxu0 %vm251_vm0, %v240_v18  ;;  %v468_v18 = vlaneseq }
  0x3a   : > { %698 = vmatmul.mubr.msk.f32.gmra.mrb[14].mxu0 %vm251_vm0, %v241_v19  ;;  %v469_v19 = vshrl.u32 %v468_v18, 7 }
  0x3c   : > { %v470_v21 = vsub.s32 0, %v469_v19 }
  0x92   : > { %v466_v22 = vpop.permute.xlu0 %465 }
  0x93   : > { %v471_v23 = vrot.slane %v466_v22, %v470_v21 }
  0xf1   : > { %v678_v25 = vpop.f32.mrb[0].mxu0 }
  0xf2   : > { %v372_v26 = vadd.f32 %v678_v25, %v617_v24  ;;  %v366_v27 = vpop.f32.mrb[1].mxu0 }
  0xf3   : > { %v367_v28 = vadd.f32 %v617_v24, %v366_v27 }
  0xf4   : > { %v446_v29 = vmax.f32 %v372_v26, 0.0 }
  0xf5   : > { %v445_v30 = vmax.f32 %v367_v28, 0.0  ;;  %v681_v31 = vpop.f32.mrb[2].mxu0 }
  0xf6   : > { %v382_v32 = vadd.f32 %v681_v31, %v617_v24  ;;  %v376_v33 = vpop.f32.mrb[3].mxu0 }
  0xf7   : > { %v377_v34 = vadd.f32 %v617_v24, %v376_v33  ;;  %v740_v35 = vpack.c.bf16 %v446_v29, %v445_v30 }
  0xf8   : > { %v448_v36 = vmax.f32 %v382_v32, 0.0 }
  0xf9   : > { %v447_v37 = vmax.f32 %v377_v34, 0.0  ;;  %741 = vmatpush3.bf16.xpose.msra.mxu1 %v740_v35  ;;  %v684_v38 = vpop.f32.mrb[4].mxu0 }
  0xfa   : > { %v392_v39 = vadd.f32 %v684_v38, %v617_v24  ;;  %742 = vmatprep.subr.bf16.mxu1 %v871_v20  ;;  %v386_v40 = vpop.f32.mrb[5].mxu0 }
  0xfb   : > { %v743_v41 = vpack.c.bf16 %v448_v36, %v447_v37  ;;  %v387_v42 = vadd.f32 %v617_v24, %v386_v40 }
  0xfc   : > { %v450_v43 = vmax.f32 %v392_v39, 0.0 }
  0xfd   : > { %v449_v44 = vmax.f32 %v387_v42, 0.0  ;;  %v687_v45 = vpop.f32.mrb[6].mxu0 }
  0xfe   : > { %v402_v46 = vadd.f32 %v687_v45, %v617_v24  ;;  %v396_v47 = vpop.f32.mrb[7].mxu0 }
  0xff   : > { %v746_v48 = vpack.c.bf16 %v450_v43, %v449_v44  ;;  %v397_v49 = vadd.f32 %v617_v24, %v396_v47 }
 0x100   : > { %v452_v50 = vmax.f32 %v402_v46, 0.0 }
 0x101   : > { %744 = vmatpush3.bf16.xpose.msra.mxu1 %v743_v41  ;;  %v451_v51 = vmax.f32 %v397_v49, 0.0  ;;  %v690_v52 = vpop.f32.mrb[8].mxu0 }
 0x102   : > { %745 = vmatprep.subr.bf16.mxu1 %v871_v20  ;;  %v412_v53 = vadd.f32 %v690_v52, %v617_v24  ;;  %v406_v54 = vpop.f32.mrb[9].mxu0 }
 0x103   : > { %v749_v55 = vpack.c.bf16 %v452_v50, %v451_v51  ;;  %v407_v56 = vadd.f32 %v617_v24, %v406_v54 }
 0x104   : > { %v454_v57 = vmax.f32 %v412_v53, 0.0 }
 0x105   : > { %v453_v58 = vmax.f32 %v407_v56, 0.0  ;;  %v693_v59 = vpop.f32.mrb[10].mxu0 }
 0x106   : > { %v422_v60 = vadd.f32 %v693_v59, %v617_v24  ;;  %v416_v61 = vpop.f32.mrb[11].mxu0 }
 0x107   : > { %v752_v62 = vpack.c.bf16 %v454_v57, %v453_v58  ;;  %v417_v63 = vadd.f32 %v617_v24, %v416_v61 }
 0x108   : > { %v456_v0 = vmax.f32 %v422_v60, 0.0 }
 0x109   : > { %747 = vmatpush3.bf16.xpose.msra.mxu1 %v746_v48  ;;  %v455_v1 = vmax.f32 %v417_v63, 0.0  ;;  %v696_v2 = vpop.f32.mrb[12].mxu0 }
 0x10a   : > { %748 = vmatprep.subr.bf16.mxu1 %v871_v20  ;;  %v432_v3 = vadd.f32 %v696_v2, %v617_v24  ;;  %v426_v4 = vpop.f32.mrb[13].mxu0 }
 0x10b   : > { %v755_v5 = vpack.c.bf16 %v456_v0, %v455_v1  ;;  %v427_v6 = vadd.f32 %v617_v24, %v426_v4 }
 0x10c   : > { %v458_v7 = vmax.f32 %v432_v3, 0.0 }
 0x10d   : > { %v457_v8 = vmax.f32 %v427_v6, 0.0  ;;  %v699_v9 = vpop.f32.mrb[14].mxu0 }
 0x10e   : > { %v442_v10 = vadd.f32 %v699_v9, %v617_v24  ;;  %v436_v11 = vpop.f32.mrb[15].mxu0 }
 0x10f   : > { %v758_v12 = vpack.c.bf16 %v458_v7, %v457_v8  ;;  %v437_v13 = vadd.f32 %v617_v24, %v436_v11 }
 0x110   : > { %v460_v14 = vmax.f32 %v442_v10, 0.0 }
 0x111   : > { %750 = vmatpush3.bf16.xpose.msra.mxu1 %v749_v55  ;;  %v459_v15 = vmax.f32 %v437_v13, 0.0 }
 0x112   : > { %751 = vmatprep.subr.bf16.mxu1 %v871_v20 }
 0x113   : > { %v761_v16 = vpack.c.bf16 %v460_v14, %v459_v15 }
 0x119   : > { %753 = vmatpush3.bf16.xpose.msra.mxu1 %v752_v62 }
 0x11a   : > { %754 = vmatprep.subr.bf16.mxu1 %v871_v20 }
 0x121   : > { %756 = vmatpush3.bf16.xpose.msra.mxu1 %v755_v5 }
 0x122   : > { %757 = vmatprep.subr.bf16.mxu1 %v871_v20 }
 0x129   : > { %759 = vmatpush3.bf16.xpose.msra.mxu1 %v758_v12 }
 0x12a   : > { %760 = vmatprep.subr.bf16.mxu1 %v871_v20 }
 0x131   : > { %762 = vmatpush3.bf16.xpose.msra.mxu1 %v761_v16 }
 0x138   : > { %733 = vmatmul.mubr.f32.vlgmr.msra.gmra.mrb[0].mxu1 %v461_v17 }
 0x20b   : > { %v538_v24 = vpop.f32.mrb[0].mxu1 }
 0x20c   : > { %v539_v25 = vadd.f32 %v538_v24, %v471_v23  ;;  %v734_v26 = vpop.f32.mrb[1].mxu1 }
 0x20e   : > { %542 = vst [vmem:[%s219_s24] sm:$0x1] %v539_v25 }
 0x20f   : > { %820 = shalt.err (!%p817_p3)
}
 0x210   : > { %s821_s10 = scalar_lea.hbm %s1020_s7, 16  ;;  %s825_s16 = scalar_lea.hbm %s1067_s5, 64 }
 0x211   : > { %p822_p4 = scmp.ne.s32.totalorder %s1020_s7, %s821_s10  ;;  %p826_p9 = scmp.lt.u32.totalorder %s1020_s7, %s1067_s5 }
 0x212   : > { %p827_p10 = scmp.lt.u32.totalorder %s825_s16, %s821_s10  ;;  %p829_p12 = scmp.lt.u32.totalorder %s821_s10, %s1020_s7 }
 0x213   : > { %p823_p7 = pnand %p822_p4, %p944_p5 }
 0x214   : > { %p828_p11 = por %p827_p10, %p826_p9 }
 0x215   : > { %p824_p8 = pneg %p823_p7 }
 0x216   : > { %p830_p13 = por %p829_p12, %p828_p11 }
 0x218   : > { %p831_p0 = pnand %p830_p13, %p824_p8 }
 0x21a   : > { %834 = shalt.err (!%p831_p0)
}
 0x21b   : > { %763 = dma.vmem_to_hbm [thread:$0]  (%p944_p5), %s1022_s26, 16, %s1020_s7, %s544_s8  }
 0x21c PF: > { %p769_p1 = scmp.ge.s32.totalorder %s869_s23, 2  ;;  %s568_s19 = sand.u32 1, %s857_s20  }
 0x21d   : > { %s569_s4 = scalar_lea.sflag [#allocation4], %s568_s19 }
 0x21e   : > { %p766_p2 = pnand %p769_p1, %p948_p6 }
 0x220   : > { %852 = dma.done.wait (!%p766_p2), %s569_s4, 16  }
 0x221   : > { %854 = vsyncadd (!%p766_p2), %s569_s4, 4294967280  ;;  %p17_p3 = scmp.ge.s32.totalorder %s932_s25, 6   ;;  %s1070_s20 = smov %s861_s21 }
 0x222   : > { %s1071_s21 = smov %s865_s22  ;;  %s1072_s22 = smov %s942_s28 }
 0x223   : > { %s1073_s23 = smov %s932_s25  ;;  %19 = sbr.rel (!%p17_p3) target bundleno = 6 (0x6), region = 75 }
 0x22a   :  { %573 = vsyncpa [#allocation4], 1 }
 0x22b   :  { %575 = vsyncpa [#allocation4 + $0x1], 1 }

</bundles_post_ra>
